<compile_context>
chip_gen: v7x
topology: tpu7x:2x2x1
jax: 0.10.0
libtpu: 0.0.40
codegen_flags: <defaults>
</compile_context>

<pallas_src>
import functools

import jax
import jax.numpy as jnp
from jax.experimental import pallas as pl
from jax.experimental.pallas import tpu as pltpu


# ---------------------------------------------------------------------------
# Small helpers: padded-VMEM accounting and block sizing.
# ---------------------------------------------------------------------------
def _round_up(x, m):
    return (x + m - 1) // m * m


def _sublane(dtype):
    return 8 * max(1, 4 // jnp.dtype(dtype).itemsize)


def _padded_vmem_bytes(shape, dtype):
    """VMEM footprint of a block: last dim padded to 128 lanes, second-to-last
    to the dtype's sublane tile (8 for 32-bit, 16 for 16-bit)."""
    d = jnp.dtype(dtype)
    lead = 1
    for s in shape[:-2]:
        lead *= int(s)
    rows = _round_up(int(shape[-2]), _sublane(d)) if len(shape) >= 2 else 1
    cols = _round_up(int(shape[-1]), 128)
    return lead * rows * cols * d.itemsize


def _vmem_capacity_bytes():
    try:
        return int(pltpu.get_tpu_info().vmem_capacity_bytes)
    except Exception:
        return 64 * 1024 * 1024  # conservative fallback (v7x-sized)


def _vmem_limit(footprint, vmem_cap):
    limit = footprint * 5 // 4 + (8 << 20)  # margin for Mosaic internal scratch
    limit = min(limit, vmem_cap * 3 // 4)
    return int(max(limit, 16 << 20))


def _pick_block(nc, budget, block_bytes_fn):
    """Largest channel-block B (multiple of 8, or == nc) whose padded footprint
    fits `budget`; keeps >=2 grid steps when nc is large enough (v7x 2nd core)."""
    per_row = max(1, block_bytes_fn(8) // 8)
    b = max(1, budget // per_row)
    if nc >= 16:
        b = min(b, max(8, (nc // 2) // 8 * 8))
    if b >= nc:
        return nc                       # single full block: always layout-legal
    b = max(8, (b // 8) * 8)            # partial blocks must stay sublane-aligned
    return min(b, nc)


# ---------------------------------------------------------------------------
# 1-D interpolation matrices (exact PyTorch semantics).
# ---------------------------------------------------------------------------
def _interp_matrix(out_size, in_size, mode, align_corners):
    """Returns W of shape (out_size, in_size) s.t. y = W @ x reproduces
    F.interpolate along one spatial axis (float32)."""
    if mode == "nearest":
        src = jnp.floor(jnp.arange(out_size) * (in_size / out_size)).astype(jnp.int32)
        src = jnp.clip(src, 0, in_size - 1)
        return jax.nn.one_hot(src, in_size, dtype=jnp.float32)

    # 'bilinear' / 'linear'
    if align_corners:
        if out_size == 1:
            src = jnp.zeros((out_size,), jnp.float32)
        else:
            src = jnp.arange(out_size, dtype=jnp.float32) * (in_size - 1) / (out_size - 1)
    else:
        scale = in_size / out_size
        src = (jnp.arange(out_size, dtype=jnp.float32) + 0.5) * scale - 0.5
        src = jnp.clip(src, 0.0, float(in_size - 1))
    lo = jnp.floor(src).astype(jnp.int32)
    hi = jnp.minimum(lo + 1, in_size - 1)
    frac = src - lo.astype(jnp.float32)
    return (jax.nn.one_hot(lo, in_size, dtype=jnp.float32) * (1.0 - frac)[:, None]
            + jax.nn.one_hot(hi, in_size, dtype=jnp.float32) * frac[:, None])


# ---------------------------------------------------------------------------
# Kernels.
# ---------------------------------------------------------------------------
def _kron_kernel(x_ref, w_ref, o_ref, *, cdt):
    # x: (B, H_in*W_in), w: (H_in*W_in, H_out*W_out) — one lane-dense merged matmul.
    x = x_ref[...].astype(cdt)
    o_ref[...] = jnp.dot(x, w_ref[...],
                         preferred_element_type=jnp.float32).astype(o_ref.dtype)


def _separable_kernel(x_ref, wh_ref, wwt_ref, o_ref, *, B, H_in, W_in, H_out, W_out,
                      height_first, cdt):
    x = x_ref[...].astype(cdt)          # (B, H_in, W_in)
    wh = wh_ref[...]                    # (H_out, H_in)
    wwt = wwt_ref[...]                  # (W_in, W_out)
    sub = _sublane(cdt)

    def width_pass(v, rows):
        # Contract W on the lane axis; fold (B, rows) into one MXU M-dim when the
        # reshape is layout-free.
        if rows % sub == 0:
            t = jnp.dot(v.reshape(B * rows, W_in), wwt,
                        preferred_element_type=jnp.float32)
            return t.reshape(B, rows, W_out)
        # Last resort: batched matmul (weights replicated per batch row).
        return jax.lax.dot_general(
            v, jnp.broadcast_to(wwt, (B, W_in, W_out)),
            (((2,), (1,)), ((0,), (0,))), preferred_element_type=jnp.float32)

    def height_pass(v, cols):
        # Contract H: transpose so H lands on the lane axis, then one merged
        # (B*cols, H_in) @ (H_in, H_out) matmul.
        if cols % sub == 0:
            vt = jnp.swapaxes(v, 1, 2).reshape(B * cols, H_in)
            t = jax.lax.dot_general(vt, wh, (((1,), (1,)), ((), ())),
                                    preferred_element_type=jnp.float32)
            return jnp.swapaxes(t.reshape(B, cols, H_out), 1, 2)
        return jax.lax.dot_general(
            jnp.broadcast_to(wh, (B, H_out, H_in)), v,
            (((2,), (1,)), ((0,), (0,))), preferred_element_type=jnp.float32)

    if height_first:
        t = height_pass(x, W_in).astype(cdt)        # (B, H_out, W_in)
        out = width_pass(t, H_out)                  # (B, H_out, W_out) f32
    else:
        t = width_pass(x, H_in).astype(cdt)         # (B, H_in, W_out)
        out = height_pass(t, W_out)                 # (B, H_out, W_out) f32
    o_ref[...] = out.astype(o_ref.dtype)


# ---------------------------------------------------------------------------
# Wrapper.
# ---------------------------------------------------------------------------
def interpolate(x, size, mode="bilinear", align_corners=False, compute_dtype=None):
    """Pallas equivalent of Interpolate(size, mode, align_corners)(x); x is NCHW."""
    if isinstance(size, int):
        size = (size, size)
    if mode not in ("nearest", "bilinear", "linear"):
        raise NotImplementedError(f"mode={mode!r} not supported")

    N, C, H_in, W_in = x.shape
    H_out, W_out = size
    NC = N * C
    x_dt = jnp.dtype(x.dtype)

    # 'nearest' is pure selection -> keep the one-hot matmul in f32 so outputs are
    # exact copies of input values.  'bilinear' defaults to bf16 (f32 accumulate).
    if compute_dtype is None:
        cdt = jnp.dtype(jnp.float32) if mode == "nearest" else jnp.dtype(jnp.bfloat16)
    else:
        cdt = jnp.dtype(compute_dtype)

    wh = _interp_matrix(H_out, H_in, mode, align_corners)   # (H_out, H_in) f32
    ww = _interp_matrix(W_out, W_in, mode, align_corners)   # (W_out, W_in) f32

    vmem_cap = _vmem_capacity_bytes()
    block_budget = int(vmem_cap * 2 // 5)   # ~51 MiB on 128 MiB parts, ~25 MiB on v7x

    K_in, K_out = H_in * W_in, H_out * W_out
    kron_w_bytes = 2 * _padded_vmem_bytes((K_in, K_out), cdt)
    use_kron = (K_in * K_out <= (1 << 23)) and (kron_w_bytes <= block_budget // 2)

    if use_kron:
        # --- lane-dense single-matmul path --------------------------------------
        w_kron = jnp.kron(wh, ww).T.astype(cdt)      # (K_in, K_out)

        def block_bytes(b):
            return (2 * _padded_vmem_bytes((b, K_in), x_dt)        # pipelined input
                    + 2 * _padded_vmem_bytes((b, K_out), x_dt)     # pipelined output
                    + _padded_vmem_bytes((b, K_in), cdt)           # in-kernel cast
                    + _padded_vmem_bytes((b, K_out), jnp.float32)) # f32 accumulator

        B = _pick_block(NC, max(1, block_budget - kron_w_bytes), block_bytes)
        footprint = kron_w_bytes + block_bytes(B)

        cost = pl.CostEstimate(
            flops=2 * NC * K_in * K_out,
            transcendentals=0,
            bytes_accessed=NC * (K_in + K_out) * x_dt.itemsize + K_in * K_out * cdt.itemsize)

        xf = x.reshape(NC, K_in)                      # free row-major reshape
        out = pl.pallas_call(
            functools.partial(_kron_kernel, cdt=cdt),
            out_shape=jax.ShapeDtypeStruct((NC, K_out), x.dtype),
            grid=(pl.cdiv(NC, B),),
            in_specs=[
                pl.BlockSpec((B, K_in), lambda i: (i, 0)),
                pl.BlockSpec((K_in, K_out), lambda i: (0, 0)),
            ],
            out_specs=pl.BlockSpec((B, K_out), lambda i: (i, 0)),
            compiler_params=pltpu.CompilerParams(
                dimension_semantics=("parallel",),
                vmem_limit_bytes=_vmem_limit(footprint, vmem_cap)),
            cost_estimate=cost,
        )(xf, w_kron)
        return out.reshape(N, C, H_out, W_out)

    # --- separable fallback for large spatial sizes -----------------------------
    whc = wh.astype(cdt)                              # (H_out, H_in)
    wwt = ww.T.astype(cdt)                            # (W_in, W_out)

    flops_w_first = H_in * W_in * W_out + H_out * H_in * W_out
    flops_h_first = H_out * H_in * W_in + H_out * W_in * W_out
    height_first = flops_h_first < flops_w_first
    mid = (H_out, W_in) if height_first else (H_in, W_out)

    def block_bytes(b):
        return (2 * _padded_vmem_bytes((b, H_in, W_in), x_dt)
                + 2 * _padded_vmem_bytes((b, H_out, W_out), x_dt)
                + _padded_vmem_bytes((b, H_in, W_in), cdt)
                + _padded_vmem_bytes((b,) + mid, jnp.float32)
                + _padded_vmem_bytes((b,) + mid, cdt)
                + _padded_vmem_bytes((b, H_out, W_out), jnp.float32))

    fixed = 2 * (_padded_vmem_bytes((H_out, H_in), cdt)
                 + _padded_vmem_bytes((W_in, W_out), cdt))
    B = _pick_block(NC, max(1, block_budget - fixed), block_bytes)
    footprint = fixed + block_bytes(B)

    cost = pl.CostEstimate(
        flops=2 * NC * (flops_h_first if height_first else flops_w_first),
        transcendentals=0,
        bytes_accessed=(NC * (H_in * W_in + H_out * W_out) * x_dt.itemsize
                        + (H_out * H_in + W_in * W_out) * cdt.itemsize))

    kernel = functools.partial(
        _separable_kernel, B=B, H_in=H_in, W_in=W_in, H_out=H_out, W_out=W_out,
        height_first=height_first, cdt=cdt)

    xf = x.reshape(NC, H_in, W_in)
    out = pl.pallas_call(
        kernel,
        out_shape=jax.ShapeDtypeStruct((NC, H_out, W_out), x.dtype),
        grid=(pl.cdiv(NC, B),),
        in_specs=[
            pl.BlockSpec((B, H_in, W_in), lambda i: (i, 0, 0)),
            pl.BlockSpec((H_out, H_in), lambda i: (0, 0)),
            pl.BlockSpec((W_in, W_out), lambda i: (0, 0)),
        ],
        out_specs=pl.BlockSpec((B, H_out, W_out), lambda i: (i, 0, 0)),
        compiler_params=pltpu.CompilerParams(
            dimension_semantics=("parallel",),
            vmem_limit_bytes=_vmem_limit(footprint, vmem_cap)),
        cost_estimate=cost,
    )(xf, whc, wwt)
    return out.reshape(N, C, H_out, W_out)


if __name__ == "__main__":
    key = jax.random.PRNGKey(0)
    x = jax.random.normal(key, (2, 4, 16, 16), dtype=jnp.float32)

    # Module config: Interpolate(size=(32, 32), mode='bilinear', align_corners=False)
    y = interpolate(x, size=(32, 32), mode="bilinear", align_corners=False)
    y = jax.block_until_ready(y)
    assert y.shape == (2, 4, 32, 32)
    assert bool(jnp.all(jnp.isfinite(y)))

    # Correctness vs an f32 reference from the same matrices
    # (bf16 MXU inputs with f32 accumulation -> ~1e-3 relative error expected).
    wh_ref = _interp_matrix(32, 16, "bilinear", False)
    ww_ref = _interp_matrix(32, 16, "bilinear", False)
    ref = jnp.einsum("oh,nchw,pw->ncop", wh_ref, x, ww_ref)
    assert bool(jnp.max(jnp.abs(y - ref)) < 0.15)

    # 'nearest' path: f32 one-hot selection, should match a gather reference.
    yn = jax.block_until_ready(interpolate(x, size=(8, 8), mode="nearest"))
    idx = jnp.floor(jnp.arange(8) * (16 / 8)).astype(jnp.int32)
    ref_n = x[:, :, idx][:, :, :, idx]
    assert yn.shape == (2, 4, 8, 8)
    assert bool(jnp.max(jnp.abs(yn - ref_n)) < 1e-5)

    print("KERNEL_OK")
</pallas_src>

<mosaic_0001>
module attributes {stable_mosaic.version = 11 : i64} {
  func.func @_kron_kernel(%arg0: i32, %arg1: memref<8x256xf32, #tpu.memory_space<vmem>>, %arg2: memref<256x1024xbf16, #tpu.memory_space<vmem>>, %arg3: memref<8x1024xf32, #tpu.memory_space<vmem>>) attributes {dimension_semantics = [#tpu.dimension_semantics<parallel>], iteration_bounds = array<i64: 1>, scalar_prefetch = 0 : i64, scratch_operands = 0 : i64, tpu.core_type = #tpu.core_type<tc>, window_params = [{transform_indices = @transform_0, window_bounds = array<i64: 8, 256>}, {pipeline_mode = #tpu.pipeline_mode<synchronous>, transform_indices = @transform_1, window_bounds = array<i64: 256, 1024>}, {transform_indices = @transform_2, window_bounds = array<i64: 8, 1024>}]} {
    %c0 = arith.constant 0 : index
    %c0_0 = arith.constant 0 : index
    %0 = vector.load %arg1[%c0, %c0_0] : memref<8x256xf32, #tpu.memory_space<vmem>>, vector<8x256xf32>
    %1 = arith.truncf %0 : vector<8x256xf32> to vector<8x256xbf16>
    %c0_1 = arith.constant 0 : index
    %c0_2 = arith.constant 0 : index
    %2 = vector.load %arg2[%c0_1, %c0_2] : memref<256x1024xbf16, #tpu.memory_space<vmem>>, vector<256x1024xbf16>
    %cst = arith.constant dense<0.000000e+00> : vector<8x1024xf32>
    %3 = tpu.matmul %1, %2, %cst {dimension_numbers = #tpu.dot_dimension_numbers<[1], [0], [0], [1], [0, 0, 1, 1], [], []>} : vector<8x256xbf16>, vector<256x1024xbf16>, vector<8x1024xf32> -> vector<8x1024xf32>
    %c0_3 = arith.constant 0 : index
    %c0_4 = arith.constant 0 : index
    %4 = vector.load %arg3[%c0_3, %c0_4] : memref<8x1024xf32, #tpu.memory_space<vmem>>, vector<8x1024xf32>
    tpu.vector_store %arg3[%c0_3, %c0_4], %3 {strides = array<i32>} : memref<8x1024xf32, #tpu.memory_space<vmem>>, vector<8x1024xf32>,
    return
  }
  func.func @transform_0(%arg0: i32) -> (i32, i32) {
    %c0_i32 = arith.constant 0 : i32
    %c0_i32_0 = arith.constant 0 : i32
    return %arg0, %c0_i32 : i32, i32
  }
  func.func @transform_1(%arg0: i32) -> (i32, i32) {
    %c0_i32 = arith.constant 0 : i32
    %c0_i32_0 = arith.constant 0 : i32
    %c0_i32_1 = arith.constant 0 : i32
    return %c0_i32, %c0_i32_0 : i32, i32
  }
  func.func @transform_2(%arg0: i32) -> (i32, i32) {
    %c0_i32 = arith.constant 0 : i32
    %c0_i32_0 = arith.constant 0 : i32
    return %arg0, %c0_i32 : i32, i32
  }
}

</mosaic_0001>

<bundles_post_ra>
// kernel: tpu_custom_call.1
= control target key start
LH: loop header
LB: loop body
LE: loop exit
PB: predicated region body
PF: predicated region fallthrough
CT: control target
= control target key end

     0   :  { %7 = vsyncpa [#allocation3], 0  ;;  %s1278_s0 = inlined_call_operand.hbm [shape: f32[8,256], index: 0, kind: input, shape index: {}]   ;;  %s1279_s1 = inlined_call_operand.hbm [shape: bf16[256,1024], index: 1, kind: input, shape index: {}]   ;;  %s1280_s2 = inlined_call_operand.hbm [shape: f32[8,1024], index: 2, kind: output, shape index: {}]  }
   0x1   :  { %8 = vsyncpa [#allocation6], 0 }
   0x2   :  { %9 = vsyncpa [#allocation4], 0  ;;  %s1203_s9 = smov [#allocation2]   ;;  %s1204_s11 = smov [#allocation5]  }
   0x3   :  { %s16_s10 = sshll.u32 %s1203_s9, 4  ;;  %s25_s12 = sshll.u32 %s1204_s11, 4  ;;  %s17_s10 = int_to_ptr.vmem [resolvable:$true] %s16_s10  ;;  %s1223_s12 = int_to_ptr.vmem [resolvable:$true] %s25_s12 }
   0x4   :  { %s1131_s15 = scalar_lea.hbm %s1278_s0, 256 }
   0x5   :  { %p1132_p0 = scmp.ne.s32.totalorder %s1278_s0, %s1131_s15  ;;  %p1135_p1 = scmp.lt.u32.totalorder %s1131_s15, %s1278_s0 }
   0x7   :  { %p1137_p2 = pnand %p1135_p1, %p1132_p0 }
   0x9   :  { %1140 = shalt.err (!%p1137_p2)
}
   0xa   :  { %s1141_s20 = scalar_lea.vmem %s17_s10, 256  ;;  %p1146_p4 = scmp.lt.s32.totalorder %s17_s10, %s17_s10 }
   0xb   :  { %p1142_p3 = scmp.ne.s32.totalorder %s17_s10, %s1141_s20  ;;  %p1147_p5 = scmp.lt.s32.totalorder %s1141_s20, %s1141_s20 }
   0xd   :  { %p1148_p6 = por %p1147_p5, %p1146_p4 }
   0xf   :  { %p1149_p7 = pnand %p1148_p6, %p1142_p3 }
  0x11   :  { %1152 = shalt.err (!%p1149_p7)
}
  0x12   :  { %19 = dma.hbm_to_vmem [thread:$0]  %s1278_s0, 256, %s17_s10, [#allocation3]  }
  0x13   :  { %s1153_s25 = scalar_lea.hbm %s1279_s1, 16384 }
  0x14   :  { %p1154_p8 = scmp.ne.s32.totalorder %s1279_s1, %s1153_s25  ;;  %p1157_p9 = scmp.lt.u32.totalorder %s1153_s25, %s1279_s1 }
  0x16   :  { %p1159_p10 = pnand %p1157_p9, %p1154_p8 }
  0x18   :  { %1162 = shalt.err (!%p1159_p10)
}
  0x19   :  { %s1163_s30 = scalar_lea.vmem %s1223_s12, 16384  ;;  %p1168_p12 = scmp.lt.s32.totalorder %s1223_s12, %s1223_s12 }
  0x1a   :  { %p1164_p11 = scmp.ne.s32.totalorder %s1223_s12, %s1163_s30  ;;  %p1169_p13 = scmp.lt.s32.totalorder %s1163_s30, %s1163_s30 }
  0x1c   :  { %p1170_p0 = por %p1169_p13, %p1168_p12 }
  0x1e   :  { %p1171_p1 = pnand %p1170_p0, %p1164_p11 }
  0x20   :  { %1174 = shalt.err (!%p1171_p1)
}
  0x21   :  { %s1205_s0 = smov 512   ;;  %s1206_s3 = smov 32  }
  0x22   :  { %31 = dma.hbm_to_vmem [thread:$0]  %s1279_s1, 16384, %s1223_s12, [#allocation6], %s1205_s0, %s1205_s0, %s1206_s3  }
  0x23   :  { %1197 = dma.done.wait [#allocation3], 256  }
  0x24   :  { %1198 = vsyncadd [#allocation3], 4294967040 }
  0x25   :  { %1199 = dma.done.wait [#allocation6], 16384  }
  0x26   :  { %1200 = vsyncadd [#allocation6], 4294950912  ;;  %v42_v0 = vld [vmem:[#allocation5] sm:$0xff]  ;;  %v43_v2 = vld [vmem:[#allocation5 + $0x8] sm:$0xff]  ;;  %s1207_s1 = smov [#allocation7]  }
  0x27   :  { %v46_v1 = vld [vmem:[#allocation5 + $0x20] sm:$0xff]  ;;  %v47_v4 = vld [vmem:[#allocation5 + $0x28] sm:$0xff]  ;;  %v39_v53 = vld [vmem:[#allocation2 + $0x8] sm:$0xff]  ;;  %s988_s6 = sshll.u32 %s1207_s1, 4  ;;  %s989_s6 = int_to_ptr.vmem [resolvable:$true] %s988_s6 }
  0x28   :  { %v999_v3 = vcombine.high %v42_v0, %v46_v1  ;;  %v998_v5 = vcombine.low %v42_v0, %v46_v1  ;;  %v50_v6 = vld [vmem:[#allocation5 + $0x40] sm:$0xff]  ;;  %v1001_v8 = vcombine.high %v43_v2, %v47_v4  ;;  %v1000_v9 = vcombine.low %v43_v2, %v47_v4  ;;  %v51_v11 = vld [vmem:[#allocation5 + $0x48] sm:$0xff]  ;;  %s1175_s7 = scalar_lea.vmem %s989_s6, 1024  ;;  %p1180_p3 = scmp.lt.s32.totalorder %s989_s6, %s989_s6 }
  0x29   :  { %v54_v7 = vld [vmem:[#allocation5 + $0x60] sm:$0xff]  ;;  %v55_v12 = vld [vmem:[#allocation5 + $0x68] sm:$0xff]  ;;  %v1254_v57 = vpack.c.bf16 %v39_v53, %v39_v53  ;;  %p1176_p2 = scmp.ne.s32.totalorder %s989_s6, %s1175_s7  ;;  %p1181_p4 = scmp.lt.s32.totalorder %s1175_s7, %s1175_s7 }
  0x2a   :  { %v1007_v10 = vcombine.high %v50_v6, %v54_v7  ;;  %v58_v13 = vld [vmem:[#allocation5 + $0x80] sm:$0xff]  ;;  %810 = vmatprep.subr.bf16.mxu0 %v999_v3  ;;  %v1009_v14 = vcombine.high %v51_v11, %v55_v12  ;;  %v59_v16 = vld [vmem:[#allocation5 + $0x88] sm:$0xff]  ;;  %851 = vmatprep.subr.bf16.mxu1 %v1001_v8  ;;  %v1006_v18 = vcombine.low %v50_v6, %v54_v7 }
  0x2b   :  { %v62_v15 = vld [vmem:[#allocation5 + $0xa0] sm:$0xff]  ;;  %v63_v17 = vld [vmem:[#allocation5 + $0xa8] sm:$0xff]  ;;  %811 = vmatpush1.bf16.msra.mxu0 %v998_v5  ;;  %852 = vmatpush1.bf16.msra.mxu1 %v1000_v9  ;;  %v1008_v19 = vcombine.low %v51_v11, %v55_v12  ;;  %p1182_p5 = por %p1181_p4, %p1180_p3 }
  0x2c   :  { %812 = vmatprep.subr.bf16.mxu0 %v1007_v10  ;;  %v1015_v20 = vcombine.high %v58_v13, %v62_v15  ;;  %853 = vmatprep.subr.bf16.mxu1 %v1009_v14  ;;  %v1017_v21 = vcombine.high %v59_v16, %v63_v17  ;;  %v66_v22 = vld [vmem:[#allocation5 + $0xc0] sm:$0xff]  ;;  %v67_v24 = vld [vmem:[#allocation5 + $0xc8] sm:$0xff]  ;;  %v1014_v26 = vcombine.low %v58_v13, %v62_v15 }
  0x2d   :  { %v70_v23 = vld [vmem:[#allocation5 + $0xe0] sm:$0xff]  ;;  %v71_v25 = vld [vmem:[#allocation5 + $0xe8] sm:$0xff]  ;;  %v1016_v27 = vcombine.low %v59_v16, %v63_v17  ;;  %842 = vmatprep.mubr.bf16.mxu0 %v1254_v57  ;;  %883 = vmatprep.mubr.bf16.mxu1 %v1254_v57  ;;  %p1183_p6 = pnand %p1182_p5, %p1176_p2 }
  0x2e   :  { %v1023_v28 = vcombine.high %v66_v22, %v70_v23  ;;  %v1025_v29 = vcombine.high %v67_v24, %v71_v25  ;;  %v74_v30 = vld [vmem:[#allocation5 + $0x100] sm:$0xff]  ;;  %v75_v32 = vld [vmem:[#allocation5 + $0x108] sm:$0xff]  ;;  %v1022_v34 = vcombine.low %v66_v22, %v70_v23  ;;  %v1024_v35 = vcombine.low %v67_v24, %v71_v25 }
  0x2f   :  { %813 = vmatpush1.bf16.msra.mxu0 %v1006_v18  ;;  %854 = vmatpush1.bf16.msra.mxu1 %v1008_v19  ;;  %v78_v31 = vld [vmem:[#allocation5 + $0x120] sm:$0xff]  ;;  %v79_v33 = vld [vmem:[#allocation5 + $0x128] sm:$0xff] }
  0x30   :  { %814 = vmatprep.subr.bf16.mxu0 %v1015_v20  ;;  %855 = vmatprep.subr.bf16.mxu1 %v1017_v21  ;;  %v1031_v36 = vcombine.high %v74_v30, %v78_v31  ;;  %v1033_v37 = vcombine.high %v75_v32, %v79_v33  ;;  %v82_v38 = vld [vmem:[#allocation5 + $0x140] sm:$0xff]  ;;  %v83_v40 = vld [vmem:[#allocation5 + $0x148] sm:$0xff]  ;;  %v1030_v42 = vcombine.low %v74_v30, %v78_v31 }
  0x31   :  { %v86_v39 = vld [vmem:[#allocation5 + $0x160] sm:$0xff]  ;;  %v87_v41 = vld [vmem:[#allocation5 + $0x168] sm:$0xff]  ;;  %v1032_v43 = vcombine.low %v75_v32, %v79_v33 }
  0x32   :  { %v1039_v44 = vcombine.high %v82_v38, %v86_v39  ;;  %v1041_v45 = vcombine.high %v83_v40, %v87_v41  ;;  %v90_v46 = vld [vmem:[#allocation5 + $0x180] sm:$0xff]  ;;  %v91_v48 = vld [vmem:[#allocation5 + $0x188] sm:$0xff]  ;;  %v1038_v50 = vcombine.low %v82_v38, %v86_v39  ;;  %v1040_v51 = vcombine.low %v83_v40, %v87_v41 }
  0x33   :  { %815 = vmatpush1.bf16.msra.mxu0 %v1014_v26  ;;  %856 = vmatpush1.bf16.msra.mxu1 %v1016_v27  ;;  %v94_v47 = vld [vmem:[#allocation5 + $0x1a0] sm:$0xff]  ;;  %v95_v49 = vld [vmem:[#allocation5 + $0x1a8] sm:$0xff] }
  0x34   :  { %816 = vmatprep.subr.bf16.mxu0 %v1023_v28  ;;  %857 = vmatprep.subr.bf16.mxu1 %v1025_v29  ;;  %v1047_v52 = vcombine.high %v90_v46, %v94_v47  ;;  %v1049_v54 = vcombine.high %v91_v48, %v95_v49  ;;  %v98_v55 = vld [vmem:[#allocation5 + $0x1c0] sm:$0xff]  ;;  %v99_v58 = vld [vmem:[#allocation5 + $0x1c8] sm:$0xff]  ;;  %v1046_v60 = vcombine.low %v90_v46, %v94_v47 }
  0x35   :  { %v102_v56 = vld [vmem:[#allocation5 + $0x1e0] sm:$0xff]  ;;  %v103_v59 = vld [vmem:[#allocation5 + $0x1e8] sm:$0xff]  ;;  %v1048_v61 = vcombine.low %v91_v48, %v95_v49 }
  0x36   :  { %v1055_v62 = vcombine.high %v98_v55, %v102_v56  ;;  %v1057_v63 = vcombine.high %v99_v58, %v103_v59  ;;  %v106_v0 = vld [vmem:[#allocation5 + $0x200] sm:$0xff]  ;;  %v107_v2 = vld [vmem:[#allocation5 + $0x208] sm:$0xff]  ;;  %v1054_v4 = vcombine.low %v98_v55, %v102_v56  ;;  %v1056_v5 = vcombine.low %v99_v58, %v103_v59 }
  0x37   :  { %817 = vmatpush1.bf16.msra.mxu0 %v1022_v34  ;;  %858 = vmatpush1.bf16.msra.mxu1 %v1024_v35  ;;  %v110_v1 = vld [vmem:[#allocation5 + $0x220] sm:$0xff]  ;;  %v111_v3 = vld [vmem:[#allocation5 + $0x228] sm:$0xff] }
  0x38   :  { %818 = vmatprep.subr.bf16.mxu0 %v1031_v36  ;;  %859 = vmatprep.subr.bf16.mxu1 %v1033_v37  ;;  %v1063_v6 = vcombine.high %v106_v0, %v110_v1  ;;  %v1065_v7 = vcombine.high %v107_v2, %v111_v3  ;;  %v114_v8 = vld [vmem:[#allocation5 + $0x240] sm:$0xff]  ;;  %v115_v10 = vld [vmem:[#allocation5 + $0x248] sm:$0xff]  ;;  %v1062_v12 = vcombine.low %v106_v0, %v110_v1  ;;  %v44_v1 = vld [vmem:[#allocation5 + $0x10] sm:$0xff] }
  0x39   :  { %v118_v9 = vld [vmem:[#allocation5 + $0x260] sm:$0xff]  ;;  %v119_v11 = vld [vmem:[#allocation5 + $0x268] sm:$0xff]  ;;  %v1064_v13 = vcombine.low %v107_v2, %v111_v3  ;;  %v48_v2 = vld [vmem:[#allocation5 + $0x30] sm:$0xff] }
  0x3a   :  { %v1071_v14 = vcombine.high %v114_v8, %v118_v9  ;;  %v1073_v15 = vcombine.high %v115_v10, %v119_v11  ;;  %v122_v16 = vld [vmem:[#allocation5 + $0x280] sm:$0xff]  ;;  %v123_v18 = vld [vmem:[#allocation5 + $0x288] sm:$0xff]  ;;  %v1070_v20 = vcombine.low %v114_v8, %v118_v9  ;;  %v1072_v21 = vcombine.low %v115_v10, %v119_v11  ;;  %v45_v3 = vld [vmem:[#allocation5 + $0x18] sm:$0xff] }
  0x3b   :  { %819 = vmatpush1.bf16.msra.mxu0 %v1030_v42  ;;  %860 = vmatpush1.bf16.msra.mxu1 %v1032_v43  ;;  %v126_v17 = vld [vmem:[#allocation5 + $0x2a0] sm:$0xff]  ;;  %v127_v19 = vld [vmem:[#allocation5 + $0x2a8] sm:$0xff]  ;;  %v1003_v8 = vcombine.high %v44_v1, %v48_v2  ;;  %v52_v10 = vld [vmem:[#allocation5 + $0x50] sm:$0xff] }
  0x3c   :  { %820 = vmatprep.subr.bf16.mxu0 %v1039_v44  ;;  %861 = vmatprep.subr.bf16.mxu1 %v1041_v45  ;;  %v1079_v22 = vcombine.high %v122_v16, %v126_v17  ;;  %v1081_v23 = vcombine.high %v123_v18, %v127_v19  ;;  %v130_v24 = vld [vmem:[#allocation5 + $0x2c0] sm:$0xff]  ;;  %v131_v26 = vld [vmem:[#allocation5 + $0x2c8] sm:$0xff]  ;;  %v1078_v28 = vcombine.low %v122_v16, %v126_v17  ;;  %v56_v11 = vld [vmem:[#allocation5 + $0x70] sm:$0xff] }
  0x3d   :  { %v134_v25 = vld [vmem:[#allocation5 + $0x2e0] sm:$0xff]  ;;  %v135_v27 = vld [vmem:[#allocation5 + $0x2e8] sm:$0xff]  ;;  %v1080_v29 = vcombine.low %v123_v18, %v127_v19  ;;  %v1011_v17 = vcombine.high %v52_v10, %v56_v11  ;;  %v60_v19 = vld [vmem:[#allocation5 + $0x90] sm:$0xff] }
  0x3e   :  { %v1087_v30 = vcombine.high %v130_v24, %v134_v25  ;;  %v1089_v31 = vcombine.high %v131_v26, %v135_v27  ;;  %v138_v32 = vld [vmem:[#allocation5 + $0x300] sm:$0xff]  ;;  %v139_v34 = vld [vmem:[#allocation5 + $0x308] sm:$0xff]  ;;  %v1086_v36 = vcombine.low %v130_v24, %v134_v25  ;;  %v1088_v37 = vcombine.low %v131_v26, %v135_v27  ;;  %v68_v27 = vld [vmem:[#allocation5 + $0xd0] sm:$0xff] }
  0x3f   :  { %821 = vmatpush1.bf16.msra.mxu0 %v1038_v50  ;;  %862 = vmatpush1.bf16.msra.mxu1 %v1040_v51  ;;  %v142_v33 = vld [vmem:[#allocation5 + $0x320] sm:$0xff]  ;;  %v143_v35 = vld [vmem:[#allocation5 + $0x328] sm:$0xff] }
  0x40   :  { %822 = vmatprep.subr.bf16.mxu0 %v1047_v52  ;;  %863 = vmatprep.subr.bf16.mxu1 %v1049_v54  ;;  %v1095_v38 = vcombine.high %v138_v32, %v142_v33  ;;  %v1097_v39 = vcombine.high %v139_v34, %v143_v35  ;;  %v146_v40 = vld [vmem:[#allocation5 + $0x340] sm:$0xff]  ;;  %v147_v42 = vld [vmem:[#allocation5 + $0x348] sm:$0xff]  ;;  %v1094_v44 = vcombine.low %v138_v32, %v142_v33 }
  0x41   :  { %v150_v41 = vld [vmem:[#allocation5 + $0x360] sm:$0xff]  ;;  %v151_v43 = vld [vmem:[#allocation5 + $0x368] sm:$0xff]  ;;  %v1096_v45 = vcombine.low %v139_v34, %v143_v35  ;;  %v76_v35 = vld [vmem:[#allocation5 + $0x110] sm:$0xff] }
  0x42   :  { %v1103_v46 = vcombine.high %v146_v40, %v150_v41  ;;  %v1105_v47 = vcombine.high %v147_v42, %v151_v43  ;;  %v154_v48 = vld [vmem:[#allocation5 + $0x380] sm:$0xff]  ;;  %v155_v50 = vld [vmem:[#allocation5 + $0x388] sm:$0xff]  ;;  %v1102_v52 = vcombine.low %v146_v40, %v150_v41  ;;  %v1104_v53 = vcombine.low %v147_v42, %v151_v43  ;;  %v84_v42 = vld [vmem:[#allocation5 + $0x150] sm:$0xff] }
  0x43   :  { %823 = vmatpush1.bf16.msra.mxu0 %v1046_v60  ;;  %864 = vmatpush1.bf16.msra.mxu1 %v1048_v61  ;;  %v158_v49 = vld [vmem:[#allocation5 + $0x3a0] sm:$0xff]  ;;  %v159_v51 = vld [vmem:[#allocation5 + $0x3a8] sm:$0xff]  ;;  %v88_v43 = vld [vmem:[#allocation5 + $0x170] sm:$0xff] }
  0x44   :  { %824 = vmatprep.subr.bf16.mxu0 %v1055_v62  ;;  %865 = vmatprep.subr.bf16.mxu1 %v1057_v63  ;;  %v1111_v54 = vcombine.high %v154_v48, %v158_v49  ;;  %v1113_v55 = vcombine.high %v155_v50, %v159_v51  ;;  %v162_v56 = vld [vmem:[#allocation5 + $0x3c0] sm:$0xff]  ;;  %v163_v59 = vld [vmem:[#allocation5 + $0x3c8] sm:$0xff]  ;;  %v1110_v61 = vcombine.low %v154_v48, %v158_v49 }
  0x45   :  { %v166_v58 = vld [vmem:[#allocation5 + $0x3e0] sm:$0xff]  ;;  %v167_v60 = vld [vmem:[#allocation5 + $0x3e8] sm:$0xff]  ;;  %v1112_v62 = vcombine.low %v155_v50, %v159_v51  ;;  %v1043_v48 = vcombine.high %v84_v42, %v88_v43  ;;  %v92_v50 = vld [vmem:[#allocation5 + $0x190] sm:$0xff] }
  0x46   :  { %v1119_v63 = vcombine.high %v162_v56, %v166_v58  ;;  %v1121_v0 = vcombine.high %v163_v59, %v167_v60  ;;  %v96_v51 = vld [vmem:[#allocation5 + $0x1b0] sm:$0xff] }
  0x47   :  { %825 = vmatpush1.bf16.msra.mxu0 %v1054_v4  ;;  %866 = vmatpush1.bf16.msra.mxu1 %v1056_v5  ;;  %v49_v4 = vld [vmem:[#allocation5 + $0x38] sm:$0xff]  ;;  %v1118_v5 = vcombine.low %v162_v56, %v166_v58  ;;  %v1051_v56 = vcombine.high %v92_v50, %v96_v51 }
  0x48   :  { %826 = vmatprep.subr.bf16.mxu0 %v1063_v6  ;;  %867 = vmatprep.subr.bf16.mxu1 %v1065_v7  ;;  %v38_v6 = vld [vmem:[#allocation2] sm:$0xff]  ;;  %v1120_v7 = vcombine.low %v163_v59, %v167_v60  ;;  %v1005_v9 = vcombine.high %v45_v3, %v49_v4  ;;  %v1004_v16 = vcombine.low %v45_v3, %v49_v4 }
  0x49   :  { %v100_v59 = vld [vmem:[#allocation5 + $0x1d0] sm:$0xff] }
  0x4a   :  { %v104_v60 = vld [vmem:[#allocation5 + $0x1f0] sm:$0xff] }
  0x4b   :  { %827 = vmatpush1.bf16.msra.mxu0 %v1062_v12  ;;  %868 = vmatpush1.bf16.msra.mxu1 %v1064_v13  ;;  %v1258_v12 = vpack.c.bf16 %v38_v6, %v38_v6  ;;  %v53_v13 = vld [vmem:[#allocation5 + $0x58] sm:$0xff]  ;;  %v108_v3 = vld [vmem:[#allocation5 + $0x210] sm:$0xff] }
  0x4c   :  { %828 = vmatprep.subr.bf16.mxu0 %v1071_v14  ;;  %869 = vmatprep.subr.bf16.mxu1 %v1073_v15  ;;  %v57_v14 = vld [vmem:[#allocation5 + $0x78] sm:$0xff]  ;;  %v1002_v15 = vcombine.low %v44_v1, %v48_v2  ;;  %v1059_v1 = vcombine.high %v100_v59, %v104_v60  ;;  %v112_v4 = vld [vmem:[#allocation5 + $0x230] sm:$0xff] }
  0x4d   :  { %v1013_v18 = vcombine.high %v53_v13, %v57_v14  ;;  %v1012_v24 = vcombine.low %v53_v13, %v57_v14  ;;  %v113_v6 = vld [vmem:[#allocation5 + $0x238] sm:$0xff]  ;;  %v120_v13 = vld [vmem:[#allocation5 + $0x270] sm:$0xff] }
  0x4e   :  { %v117_v14 = vld [vmem:[#allocation5 + $0x258] sm:$0xff] }
  0x4f   :  { %829 = vmatpush1.bf16.msra.mxu0 %v1070_v20  ;;  %870 = vmatpush1.bf16.msra.mxu1 %v1072_v21  ;;  %v64_v20 = vld [vmem:[#allocation5 + $0xb0] sm:$0xff]  ;;  %v61_v21 = vld [vmem:[#allocation5 + $0x98] sm:$0xff] }
  0x50   :  { %830 = vmatprep.subr.bf16.mxu0 %v1079_v22  ;;  %871 = vmatprep.subr.bf16.mxu1 %v1081_v23  ;;  %v65_v22 = vld [vmem:[#allocation5 + $0xb8] sm:$0xff]  ;;  %v1010_v23 = vcombine.low %v52_v10, %v56_v11  ;;  %v1019_v25 = vcombine.high %v60_v19, %v64_v20  ;;  %v116_v11 = vld [vmem:[#allocation5 + $0x250] sm:$0xff] }
  0x51   :  { %v1021_v26 = vcombine.high %v61_v21, %v65_v22  ;;  %v1020_v32 = vcombine.low %v61_v21, %v65_v22  ;;  %v128_v21 = vld [vmem:[#allocation5 + $0x2b0] sm:$0xff]  ;;  %v125_v22 = vld [vmem:[#allocation5 + $0x298] sm:$0xff] }
  0x53   :  { %831 = vmatpush1.bf16.msra.mxu0 %v1078_v28  ;;  %872 = vmatpush1.bf16.msra.mxu1 %v1080_v29  ;;  %v72_v28 = vld [vmem:[#allocation5 + $0xf0] sm:$0xff]  ;;  %v69_v29 = vld [vmem:[#allocation5 + $0xd8] sm:$0xff] }
  0x54   :  { %832 = vmatprep.subr.bf16.mxu0 %v1087_v30  ;;  %873 = vmatprep.subr.bf16.mxu1 %v1089_v31  ;;  %v73_v30 = vld [vmem:[#allocation5 + $0xf8] sm:$0xff]  ;;  %v1018_v31 = vcombine.low %v60_v19, %v64_v20  ;;  %v1027_v33 = vcombine.high %v68_v27, %v72_v28  ;;  %v124_v20 = vld [vmem:[#allocation5 + $0x290] sm:$0xff] }
  0x55   :  { %v1029_v34 = vcombine.high %v69_v29, %v73_v30  ;;  %v1028_v40 = vcombine.low %v69_v29, %v73_v30  ;;  %v136_v29 = vld [vmem:[#allocation5 + $0x2f0] sm:$0xff]  ;;  %v133_v30 = vld [vmem:[#allocation5 + $0x2d8] sm:$0xff] }
  0x57   :  { %833 = vmatpush1.bf16.msra.mxu0 %v1086_v36  ;;  %874 = vmatpush1.bf16.msra.mxu1 %v1088_v37  ;;  %v80_v36 = vld [vmem:[#allocation5 + $0x130] sm:$0xff]  ;;  %v77_v37 = vld [vmem:[#allocation5 + $0x118] sm:$0xff] }
  0x58   :  { %834 = vmatprep.subr.bf16.mxu0 %v1095_v38  ;;  %875 = vmatprep.subr.bf16.mxu1 %v1097_v39  ;;  %v81_v38 = vld [vmem:[#allocation5 + $0x138] sm:$0xff]  ;;  %v1026_v39 = vcombine.low %v68_v27, %v72_v28  ;;  %v1035_v41 = vcombine.high %v76_v35, %v80_v36  ;;  %v132_v28 = vld [vmem:[#allocation5 + $0x2d0] sm:$0xff] }
  0x5b   :  { %835 = vmatpush1.bf16.msra.mxu0 %v1094_v44  ;;  %876 = vmatpush1.bf16.msra.mxu1 %v1096_v45  ;;  %v85_v44 = vld [vmem:[#allocation5 + $0x158] sm:$0xff] }
  0x5c   :  { %836 = vmatprep.subr.bf16.mxu0 %v1103_v46  ;;  %877 = vmatprep.subr.bf16.mxu1 %v1105_v47  ;;  %v89_v45 = vld [vmem:[#allocation5 + $0x178] sm:$0xff]  ;;  %v1034_v46 = vcombine.low %v76_v35, %v80_v36  ;;  %v1036_v47 = vcombine.low %v77_v37, %v81_v38  ;;  %v140_v36 = vld [vmem:[#allocation5 + $0x310] sm:$0xff] }
  0x5d   :  { %v1045_v49 = vcombine.high %v85_v44, %v89_v45 }
  0x5f   :  { %837 = vmatpush1.bf16.msra.mxu0 %v1102_v52  ;;  %878 = vmatpush1.bf16.msra.mxu1 %v1104_v53  ;;  %v93_v52 = vld [vmem:[#allocation5 + $0x198] sm:$0xff] }
  0x60   :  { %838 = vmatprep.subr.bf16.mxu0 %v1111_v54  ;;  %879 = vmatprep.subr.bf16.mxu1 %v1113_v55  ;;  %v97_v53 = vld [vmem:[#allocation5 + $0x1b8] sm:$0xff]  ;;  %v1042_v54 = vcombine.low %v84_v42, %v88_v43  ;;  %v1044_v55 = vcombine.low %v85_v44, %v89_v45  ;;  %v148_v43 = vld [vmem:[#allocation5 + $0x350] sm:$0xff] }
  0x61   :  { %v1053_v58 = vcombine.high %v93_v52, %v97_v53  ;;  %v152_v44 = vld [vmem:[#allocation5 + $0x370] sm:$0xff]  ;;  %v149_v45 = vld [vmem:[#allocation5 + $0x358] sm:$0xff] }
  0x63   :  { %839 = vmatpush1.bf16.msra.mxu0 %v1110_v61  ;;  %880 = vmatpush1.bf16.msra.mxu1 %v1112_v62  ;;  %v101_v61 = vld [vmem:[#allocation5 + $0x1d8] sm:$0xff] }
  0x64   :  { %840 = vmatprep.subr.bf16.mxu0 %v1119_v63  ;;  %881 = vmatprep.subr.bf16.mxu1 %v1121_v0  ;;  %v105_v62 = vld [vmem:[#allocation5 + $0x1f8] sm:$0xff]  ;;  %v1050_v63 = vcombine.low %v92_v50, %v96_v51  ;;  %v1052_v0 = vcombine.low %v93_v52, %v97_v53  ;;  %v156_v51 = vld [vmem:[#allocation5 + $0x390] sm:$0xff] }
  0x65   :  { %v1061_v2 = vcombine.high %v101_v61, %v105_v62  ;;  %v160_v52 = vld [vmem:[#allocation5 + $0x3b0] sm:$0xff]  ;;  %v157_v53 = vld [vmem:[#allocation5 + $0x398] sm:$0xff] }
  0x67   :  { %841 = vmatpush1.bf16.msra.mxu0 %v1118_v5  ;;  %882 = vmatpush1.bf16.msra.mxu1 %v1120_v7  ;;  %v109_v5 = vld [vmem:[#allocation5 + $0x218] sm:$0xff]  ;;  %v1058_v7 = vcombine.low %v100_v59, %v104_v60  ;;  %v164_v60 = vld [vmem:[#allocation5 + $0x3d0] sm:$0xff] }
  0x68   :  { %892 = vmatprep.subr.bf16.mxu0 %v1003_v8  ;;  %933 = vmatprep.subr.bf16.mxu1 %v1005_v9  ;;  %v1060_v8 = vcombine.low %v101_v61, %v105_v62  ;;  %v1067_v9 = vcombine.high %v108_v3, %v112_v4  ;;  %v1069_v10 = vcombine.high %v109_v5, %v113_v6  ;;  %v168_v61 = vld [vmem:[#allocation5 + $0x3f0] sm:$0xff]  ;;  %v165_v62 = vld [vmem:[#allocation5 + $0x3d8] sm:$0xff] }
  0x6a   :  { %843 = vmatmul.mubr.bf16.vlgmr.msra.gmra.mrb[0].mxu0 %v1258_v12  ;;  %884 = vmatmul.mubr.bf16.vlgmr.msra.gmra.mrb[0].mxu1 %v1258_v12 }
  0x6b   :  { %893 = vmatpush1.bf16.msra.mxu0 %v1002_v15  ;;  %934 = vmatpush1.bf16.msra.mxu1 %v1004_v16  ;;  %v121_v15 = vld [vmem:[#allocation5 + $0x278] sm:$0xff]  ;;  %v1066_v16 = vcombine.low %v108_v3, %v112_v4  ;;  %v1122_v4 = vcombine.low %v164_v60, %v168_v61 }
  0x6c   :  { %894 = vmatprep.subr.bf16.mxu0 %v1011_v17  ;;  %935 = vmatprep.subr.bf16.mxu1 %v1013_v18  ;;  %v1068_v17 = vcombine.low %v109_v5, %v113_v6  ;;  %v1075_v18 = vcombine.high %v116_v11, %v120_v13  ;;  %v1077_v19 = vcombine.high %v117_v14, %v121_v15 }
  0x6d   :  { %924 = vmatprep.mubr.bf16.mxu0 %v1254_v57  ;;  %965 = vmatprep.mubr.bf16.mxu1 %v1254_v57  ;;  %v1037_v57 = vcombine.high %v77_v37, %v81_v38  ;;  %v144_v37 = vld [vmem:[#allocation5 + $0x330] sm:$0xff]  ;;  %v141_v38 = vld [vmem:[#allocation5 + $0x318] sm:$0xff] }
  0x6f   :  { %895 = vmatpush1.bf16.msra.mxu0 %v1010_v23  ;;  %936 = vmatpush1.bf16.msra.mxu1 %v1012_v24  ;;  %v129_v23 = vld [vmem:[#allocation5 + $0x2b8] sm:$0xff]  ;;  %v1074_v24 = vcombine.low %v116_v11, %v120_v13 }
  0x70   :  { %896 = vmatprep.subr.bf16.mxu0 %v1019_v25  ;;  %937 = vmatprep.subr.bf16.mxu1 %v1021_v26  ;;  %v1076_v25 = vcombine.low %v117_v14, %v121_v15  ;;  %v1083_v26 = vcombine.high %v124_v20, %v128_v21  ;;  %v1085_v27 = vcombine.high %v125_v22, %v129_v23 }
  0x73   :  { %897 = vmatpush1.bf16.msra.mxu0 %v1018_v31  ;;  %938 = vmatpush1.bf16.msra.mxu1 %v1020_v32  ;;  %v137_v31 = vld [vmem:[#allocation5 + $0x2f8] sm:$0xff]  ;;  %v1082_v32 = vcombine.low %v124_v20, %v128_v21 }
  0x74   :  { %898 = vmatprep.subr.bf16.mxu0 %v1027_v33  ;;  %939 = vmatprep.subr.bf16.mxu1 %v1029_v34  ;;  %v1084_v33 = vcombine.low %v125_v22, %v129_v23  ;;  %v1091_v34 = vcombine.high %v132_v28, %v136_v29  ;;  %v1093_v35 = vcombine.high %v133_v30, %v137_v31 }
  0x77   :  { %899 = vmatpush1.bf16.msra.mxu0 %v1026_v39  ;;  %940 = vmatpush1.bf16.msra.mxu1 %v1028_v40  ;;  %v145_v39 = vld [vmem:[#allocation5 + $0x338] sm:$0xff]  ;;  %v1090_v40 = vcombine.low %v132_v28, %v136_v29 }
  0x78   :  { %900 = vmatprep.subr.bf16.mxu0 %v1035_v41  ;;  %941 = vmatprep.subr.bf16.mxu1 %v1037_v57  ;;  %v1092_v41 = vcombine.low %v133_v30, %v137_v31  ;;  %v1099_v57 = vcombine.high %v140_v36, %v144_v37  ;;  %v1101_v42 = vcombine.high %v141_v38, %v145_v39 }
  0x7b   :  { %901 = vmatpush1.bf16.msra.mxu0 %v1034_v46  ;;  %942 = vmatpush1.bf16.msra.mxu1 %v1036_v47  ;;  %v153_v46 = vld [vmem:[#allocation5 + $0x378] sm:$0xff]  ;;  %v1098_v47 = vcombine.low %v140_v36, %v144_v37 }
  0x7c   :  { %902 = vmatprep.subr.bf16.mxu0 %v1043_v48  ;;  %943 = vmatprep.subr.bf16.mxu1 %v1045_v49  ;;  %v1100_v48 = vcombine.low %v141_v38, %v145_v39  ;;  %v1107_v49 = vcombine.high %v148_v43, %v152_v44  ;;  %v1109_v50 = vcombine.high %v149_v45, %v153_v46 }
  0x7f   :  { %903 = vmatpush1.bf16.msra.mxu0 %v1042_v54  ;;  %944 = vmatpush1.bf16.msra.mxu1 %v1044_v55  ;;  %v161_v54 = vld [vmem:[#allocation5 + $0x3b8] sm:$0xff]  ;;  %v1106_v55 = vcombine.low %v148_v43, %v152_v44 }
  0x80   :  { %904 = vmatprep.subr.bf16.mxu0 %v1051_v56  ;;  %945 = vmatprep.subr.bf16.mxu1 %v1053_v58  ;;  %v1108_v56 = vcombine.low %v149_v45, %v153_v46  ;;  %v1115_v58 = vcombine.high %v156_v51, %v160_v52  ;;  %v1117_v59 = vcombine.high %v157_v53, %v161_v54 }
  0x83   :  { %905 = vmatpush1.bf16.msra.mxu0 %v1050_v63  ;;  %946 = vmatpush1.bf16.msra.mxu1 %v1052_v0  ;;  %v169_v63 = vld [vmem:[#allocation5 + $0x3f8] sm:$0xff]  ;;  %v1114_v0 = vcombine.low %v156_v51, %v160_v52 }
  0x84   :  { %906 = vmatprep.subr.bf16.mxu0 %v1059_v1  ;;  %947 = vmatprep.subr.bf16.mxu1 %v1061_v2  ;;  %v1116_v1 = vcombine.low %v157_v53, %v161_v54  ;;  %v1123_v2 = vcombine.high %v164_v60, %v168_v61  ;;  %v1125_v3 = vcombine.high %v165_v62, %v169_v63 }
  0x85   :  { %v1124_v5 = vcombine.low %v165_v62, %v169_v63 }
  0x87   :  { %907 = vmatpush1.bf16.msra.mxu0 %v1058_v7  ;;  %948 = vmatpush1.bf16.msra.mxu1 %v1060_v8 }
  0x88   :  { %908 = vmatprep.subr.bf16.mxu0 %v1067_v9  ;;  %949 = vmatprep.subr.bf16.mxu1 %v1069_v10 }
  0x8b   :  { %909 = vmatpush1.bf16.msra.mxu0 %v1066_v16  ;;  %950 = vmatpush1.bf16.msra.mxu1 %v1068_v17 }
  0x8c   :  { %910 = vmatprep.subr.bf16.mxu0 %v1075_v18  ;;  %951 = vmatprep.subr.bf16.mxu1 %v1077_v19 }
  0x8f   :  { %911 = vmatpush1.bf16.msra.mxu0 %v1074_v24  ;;  %952 = vmatpush1.bf16.msra.mxu1 %v1076_v25 }
  0x90   :  { %912 = vmatprep.subr.bf16.mxu0 %v1083_v26  ;;  %953 = vmatprep.subr.bf16.mxu1 %v1085_v27 }
  0x93   :  { %913 = vmatpush1.bf16.msra.mxu0 %v1082_v32  ;;  %954 = vmatpush1.bf16.msra.mxu1 %v1084_v33 }
  0x94   :  { %914 = vmatprep.subr.bf16.mxu0 %v1091_v34  ;;  %955 = vmatprep.subr.bf16.mxu1 %v1093_v35 }
  0x97   :  { %915 = vmatpush1.bf16.msra.mxu0 %v1090_v40  ;;  %956 = vmatpush1.bf16.msra.mxu1 %v1092_v41 }
  0x98   :  { %916 = vmatprep.subr.bf16.mxu0 %v1099_v57  ;;  %957 = vmatprep.subr.bf16.mxu1 %v1101_v42 }
  0x9b   :  { %917 = vmatpush1.bf16.msra.mxu0 %v1098_v47  ;;  %958 = vmatpush1.bf16.msra.mxu1 %v1100_v48 }
  0x9c   :  { %918 = vmatprep.subr.bf16.mxu0 %v1107_v49  ;;  %959 = vmatprep.subr.bf16.mxu1 %v1109_v50 }
  0x9f   :  { %919 = vmatpush1.bf16.msra.mxu0 %v1106_v55  ;;  %960 = vmatpush1.bf16.msra.mxu1 %v1108_v56 }
  0xa0   :  { %920 = vmatprep.subr.bf16.mxu0 %v1115_v58  ;;  %961 = vmatprep.subr.bf16.mxu1 %v1117_v59 }
  0xa3   :  { %921 = vmatpush1.bf16.msra.mxu0 %v1114_v0  ;;  %962 = vmatpush1.bf16.msra.mxu1 %v1116_v1 }
  0xa4   :  { %922 = vmatprep.subr.bf16.mxu0 %v1123_v2  ;;  %963 = vmatprep.subr.bf16.mxu1 %v1125_v3 }
  0xa7   :  { %923 = vmatpush1.bf16.msra.mxu0 %v1122_v4  ;;  %964 = vmatpush1.bf16.msra.mxu1 %v1124_v5 }
  0xaa   :  { %925 = vmatmul.mubr.bf16.vlgmr.msra.gmra.mrb[4].mxu0 %v1258_v12  ;;  %966 = vmatmul.mubr.bf16.vlgmr.msra.gmra.mrb[4].mxu1 %v1258_v12 }
 0x13d   :  { %v844_v6 = vpop.f32.mrb[0].mxu0  ;;  %v885_v7 = vpop.f32.mrb[0].mxu1 }
 0x13e   :  { %974 = vst [vmem:[#allocation7] sm:$0xff] %v844_v6  ;;  %v846_v8 = vpop.f32.mrb[1].mxu0  ;;  %976 = vst [vmem:[#allocation7 + $0x10] sm:$0xff] %v885_v7  ;;  %v887_v9 = vpop.f32.mrb[1].mxu1 }
 0x13f   :  { %975 = vst [vmem:[#allocation7 + $0x8] sm:$0xff] %v846_v8  ;;  %v848_v10 = vpop.f32.mrb[2].mxu0  ;;  %977 = vst [vmem:[#allocation7 + $0x18] sm:$0xff] %v887_v9  ;;  %v889_v11 = vpop.f32.mrb[2].mxu1 }
 0x140   :  { %v849_v13 = vpop.f32.mrb[3].mxu0  ;;  %v890_v14 = vpop.f32.mrb[3].mxu1 }
 0x17d   :  { %v926_v15 = vpop.f32.mrb[4].mxu0  ;;  %v967_v16 = vpop.f32.mrb[4].mxu1 }
 0x17e   :  { %978 = vst [vmem:[#allocation7 + $0x20] sm:$0xff] %v926_v15  ;;  %v928_v17 = vpop.f32.mrb[5].mxu0  ;;  %980 = vst [vmem:[#allocation7 + $0x30] sm:$0xff] %v967_v16  ;;  %v969_v12 = vpop.f32.mrb[5].mxu1 }
 0x17f   :  { %979 = vst [vmem:[#allocation7 + $0x28] sm:$0xff] %v928_v17  ;;  %v930_v18 = vpop.f32.mrb[6].mxu0  ;;  %981 = vst [vmem:[#allocation7 + $0x38] sm:$0xff] %v969_v12  ;;  %v971_v19 = vpop.f32.mrb[6].mxu1 }
 0x180   :  { %v931_v20 = vpop.f32.mrb[7].mxu0  ;;  %v972_v21 = vpop.f32.mrb[7].mxu1 }
 0x181   :  { %1186 = shalt.err (!%p1183_p6)
}
 0x182   :  { %s1187_s10 = scalar_lea.hbm %s1280_s2, 1024 }
 0x183   :  { %p1188_p7 = scmp.ne.s32.totalorder %s1280_s2, %s1187_s10  ;;  %p1191_p8 = scmp.lt.u32.totalorder %s1187_s10, %s1280_s2 }
 0x185   :  { %p1193_p9 = pnand %p1191_p8, %p1188_p7 }
 0x187   :  { %1196 = shalt.err (!%p1193_p9)
}
 0x188   :  { %991 = dma.vmem_to_hbm [thread:$0]  %s989_s6, 1024, %s1280_s2, [#allocation4]  }
 0x189   :  { %1201 = dma.done.wait [#allocation4], 1024  }
 0x18a   :  { %1202 = vsyncadd [#allocation4], 4294966272 }
 0x18b   :  { %995 = vsyncpa [#allocation3], 1 }
 0x18c   :  { %996 = vsyncpa [#allocation6], 1 }
 0x18d   :  { %997 = vsyncpa [#allocation4], 1 }

</bundles_post_ra>
